<compile_context>
chip_gen: v7x
topology: tpu7x:2x2x1
jax: 0.10.0
libtpu: 0.0.40
codegen_flags: <defaults>
</compile_context>

<pallas_src>
import functools

import jax
import jax.numpy as jnp
from jax.experimental import pallas as pl
from jax.experimental.pallas import tpu as pltpu

C_PAD = 128          # lane-dense channel padding (conv Cout, MLP hidden/out)
CIN1_PAD = 8         # conv1 input channels (1 -> 8)
N_CLASSES = 10

# conv1: 28x28 input, padded frame width 32 (28 + 2 + 2), 33 padded rows.
FRAME1_W = 32
CONV1_IN_ROWS = 33 * FRAME1_W              # 1056 flattened input rows
CONV1_HPAIRS = 14                          # 28 conv rows -> 14 pooled rows
TAPS1 = tuple(ky * FRAME1_W + kx for ky in range(5) for kx in range(5))

# conv2 reads conv1's pooled output laid out as an 18-wide zero-padded frame.
FRAME2_W = 18
CONV1_OUT_ROWS = 336                       # >= 19*18 incl. zero tail, mult 8
CONV2_HPAIRS = 7                           # 14 conv rows -> 7 pooled rows
TAPS2 = tuple(ky * FRAME2_W + kx for ky in range(5) for kx in range(5))
# conv1 pooled (ho, wo) -> conv2 frame row (ho + 2) * 18 + (wo + 2)
OUT_STARTS1 = tuple((r + 2) * FRAME2_W + 2 for r in range(CONV1_HPAIRS))

# conv2 pooled output: 7x7 rows (+7 zero rows) x 128 padded channels = the
# (padded) MLP feature vector, flattened for free outside the kernel.
CONV2_OUT_ROWS = 56
OUT_STARTS2 = tuple(r * 7 for r in range(CONV2_HPAIRS))
FEAT_DIM = CONV2_OUT_ROWS * C_PAD          # 7168 = 56 * 128

MODE1_D = 896                              # 784 padded to 7 * 128


def _round_up(v, m):
    return (v + m - 1) // m * m


# ----------------------------------------------------------------------------
# Pallas kernels
# ----------------------------------------------------------------------------
def _conv_relu_pool_kernel(x_ref, w_ref, b_ref, s_ref, o_ref, *,
                           frame_w, n_hpairs, tap_offsets, out_row_starts):
    """Fused 5x5 conv (stride 1, zero pad baked into x) + bias + ReLU +
    2x2/stride-2 maxpool for one image.

    x_ref: (1, L, Cin)     flattened padded NHWC input (row stride = frame_w)
    w_ref: (25, Cin, Cout) per-tap weight slices (bf16)
    b_ref: (1, Cout)       bias (f32)
    s_ref: (P, frame_w-1)  0/1 matrix selecting the even pool anchors
    o_ref: (1, R, Cout)    pooled rows scattered at out_row_starts, rest zero
    """
    cout = o_ref.shape[-1]
    tile_rows = 2 * frame_w        # one pooled row pair = two conv output rows
    win = frame_w - 1
    npool = s_ref.shape[0]

    # Zero the whole output frame once; valid rows are overwritten below.
    o_ref[...] = jnp.zeros(o_ref.shape, o_ref.dtype)

    for r in range(n_hpairs):
        base = r * tile_rows
        acc = jnp.zeros((tile_rows, cout), jnp.float32)
        for t, off in enumerate(tap_offsets):
            xs = x_ref[0, base + off:base + off + tile_rows, :]
            acc = acc + jnp.dot(xs, w_ref[t],
                                preferred_element_type=jnp.float32)
        y = jnp.maximum(acc + b_ref[...], 0.0)
        # 2x2 max over candidates (p, p+1, p+frame_w, p+frame_w+1).
        m = jnp.maximum(
            jnp.maximum(y[0:win, :], y[1:1 + win, :]),
            jnp.maximum(y[frame_w:frame_w + win, :],
                        y[frame_w + 1:frame_w + 1 + win, :]))
        # Keep only the even anchors (valid pooled columns) via a 0/1 matmul.
        pooled = jnp.dot(s_ref[...], m, preferred_element_type=jnp.float32)
        start = out_row_starts[r]
        o_ref[0, start:start + npool, :] = pooled.astype(o_ref.dtype)


def _mlp_logsoftmax_kernel(x_ref, w1_ref, b1_ref, w2_ref, b2_ref, o_ref, *,
                           n_valid, k_chunk):
    """sigmoid(x @ w1 + b1) @ w2 + b2, then log-softmax over the first
    `n_valid` output columns (remaining lanes are padding)."""
    tm = x_ref.shape[0]
    d = x_ref.shape[1]
    hpad = w1_ref.shape[1]

    acc = jnp.zeros((tm, hpad), jnp.float32)
    for k0 in range(0, d, k_chunk):                 # tile the contraction dim
        ks = min(k_chunk, d - k0)
        acc = acc + jnp.dot(x_ref[:, k0:k0 + ks], w1_ref[k0:k0 + ks, :],
                            preferred_element_type=jnp.float32)
    h = acc + b1_ref[...]
    h = 1.0 / (1.0 + jnp.exp(-h))                   # torch.sigmoid, f32
    z = jnp.dot(h.astype(w2_ref.dtype), w2_ref[...],
                preferred_element_type=jnp.float32) + b2_ref[...]

    col = jax.lax.broadcasted_iota(jnp.int32, z.shape, 1)
    zm = jnp.where(col < n_valid, z, -1e30)         # mask padded lanes
    mx = jnp.max(zm, axis=-1, keepdims=True)
    e = jnp.exp(zm - mx)
    lse = jnp.log(jnp.sum(e, axis=-1, keepdims=True))
    o_ref[...] = (zm - mx - lse).astype(o_ref.dtype)    # nn.LogSoftmax(dim=1)


# ----------------------------------------------------------------------------
# Pallas wrappers
# ----------------------------------------------------------------------------
def conv_relu_pool(x_flat, w, b, s, *, frame_w, n_hpairs, tap_offsets,
                   out_row_starts, out_rows):
    n, lp, cin = x_flat.shape
    cout = w.shape[-1]
    kernel = functools.partial(
        _conv_relu_pool_kernel, frame_w=frame_w, n_hpairs=n_hpairs,
        tap_offsets=tap_offsets, out_row_starts=out_row_starts)
    return pl.pallas_call(
        kernel,
        out_shape=jax.ShapeDtypeStruct((n, out_rows, cout), jnp.bfloat16),
        grid=(n,),
        in_specs=[
            pl.BlockSpec((1, lp, cin), lambda i: (i, 0, 0)),
            pl.BlockSpec(w.shape, lambda i: (0, 0, 0)),   # VMEM-resident
            pl.BlockSpec(b.shape, lambda i: (0, 0)),
            pl.BlockSpec(s.shape, lambda i: (0, 0)),
        ],
        out_specs=pl.BlockSpec((1, out_rows, cout), lambda i: (i, 0, 0)),
        compiler_params=pltpu.CompilerParams(
            dimension_semantics=("parallel",),
            vmem_limit_bytes=32 * 1024 * 1024),
    )(x_flat, w, b, s)


def mlp_head(x, w1, b1, w2, b2, n_valid):
    n, d = x.shape
    hpad = w1.shape[1]
    opad = w2.shape[1]
    tm = min(128, _round_up(max(n, 1), 8))
    npad = _round_up(n, tm)
    if npad != n:
        x = jnp.pad(x, ((0, npad - n), (0, 0)))
    kernel = functools.partial(_mlp_logsoftmax_kernel, n_valid=n_valid,
                               k_chunk=512)
    out = pl.pallas_call(
        kernel,
        out_shape=jax.ShapeDtypeStruct((npad, opad), jnp.float32),
        grid=(npad // tm,),
        in_specs=[
            pl.BlockSpec((tm, d), lambda i: (i, 0)),       # streamed rows
            pl.BlockSpec((d, hpad), lambda i: (0, 0)),     # resident weights
            pl.BlockSpec((1, hpad), lambda i: (0, 0)),
            pl.BlockSpec((hpad, opad), lambda i: (0, 0)),
            pl.BlockSpec((1, opad), lambda i: (0, 0)),
        ],
        out_specs=pl.BlockSpec((tm, opad), lambda i: (i, 0)),
        compiler_params=pltpu.CompilerParams(
            dimension_semantics=("parallel",),
            vmem_limit_bytes=32 * 1024 * 1024),
    )(x, w1, b1, w2, b2)
    return out[:n, :n_valid]


# ----------------------------------------------------------------------------
# Parameter init (PyTorch conventions) and one-time kernel-layout prep
# ----------------------------------------------------------------------------
def init_linear(key, in_f, out_f):
    kw, kb = jax.random.split(key)
    bound = 1.0 / float(in_f) ** 0.5
    w = jax.random.uniform(kw, (out_f, in_f), jnp.float32, -bound, bound)
    b = jax.random.uniform(kb, (out_f,), jnp.float32, -bound, bound)
    return w, b


def init_conv(key, cout, cin, k):
    kw, kb = jax.random.split(key)
    bound = 1.0 / float(cin * k * k) ** 0.5
    w = jax.random.uniform(kw, (cout, cin, k, k), jnp.float32, -bound, bound)
    b = jax.random.uniform(kb, (cout,), jnp.float32, -bound, bound)
    return w, b


def _sel_matrix(n_out, n_in):
    rows = jnp.arange(n_out)[:, None]
    cols = jnp.arange(n_in)[None, :]
    return (cols == 2 * rows).astype(jnp.float32)


def _prep_conv(w, b, cin_pad):
    cout, cin, k, _ = w.shape
    wt = jnp.transpose(w, (2, 3, 1, 0)).reshape(k * k, cin, cout)
    wt = jnp.pad(wt, ((0, 0), (0, cin_pad - cin), (0, C_PAD - cout)))
    bp = jnp.pad(b, (0, C_PAD - cout)).reshape(1, C_PAD).astype(jnp.float32)
    return wt.astype(jnp.bfloat16), bp


def _prep_linear(w, b, in_pad, out_pad):
    out_f, in_f = w.shape
    wt = jnp.pad(w.T, ((0, in_pad - in_f), (0, out_pad - out_f)))
    bp = jnp.pad(b, (0, out_pad - out_f)).reshape(1, out_pad)
    return wt.astype(jnp.bfloat16), bp.astype(jnp.float32)


def init_params_mode1(key, hidden_size):
    k1, k2 = jax.random.split(key)
    hpad = _round_up(hidden_size, 128)
    hw, hb = init_linear(k1, 28 * 28, hidden_size)
    ow, ob = init_linear(k2, hidden_size, N_CLASSES)
    w1, b1 = _prep_linear(hw, hb, MODE1_D, hpad)
    w2, b2 = _prep_linear(ow, ob, hpad, C_PAD)
    return {"h_w": w1, "h_b": b1, "o_w": w2, "o_b": b2}


def init_params_mode2(key, hidden_size):
    k1, k2, k3, k4 = jax.random.split(key, 4)
    hpad = _round_up(hidden_size, 128)
    c1w, c1b = init_conv(k1, 40, 1, 5)
    c2w, c2b = init_conv(k2, 40, 40, 5)
    hw, hb = init_linear(k3, 1960, hidden_size)
    ow, ob = init_linear(k4, hidden_size, N_CLASSES)

    c1wp, c1bp = _prep_conv(c1w, c1b, CIN1_PAD)
    c2wp, c2bp = _prep_conv(c2w, c2b, C_PAD)

    # Hidden layer: permute its input dim from the PyTorch flatten order
    # (c, h, w) over 40x7x7 to the kernel feature order ((h*7+w), c) over
    # 56 rows x 128 padded channels (matches conv2's pooled output layout).
    hw4 = hw.reshape(hidden_size, 40, 7, 7)          # (j, c, h, w)
    hw4 = jnp.transpose(hw4, (2, 3, 1, 0))           # (h, w, c, j)
    hw4 = jnp.pad(hw4, ((0, 0), (0, 0), (0, C_PAD - 40),
                        (0, hpad - hidden_size)))
    hw4 = hw4.reshape(49, C_PAD, hpad)
    hw4 = jnp.pad(hw4, ((0, CONV2_OUT_ROWS - 49), (0, 0), (0, 0)))
    hwp = hw4.reshape(FEAT_DIM, hpad).astype(jnp.bfloat16)
    hbp = jnp.pad(hb, (0, hpad - hidden_size)).reshape(1, hpad)
    hbp = hbp.astype(jnp.float32)

    owp, obp = _prep_linear(ow, ob, hpad, C_PAD)

    return {"c1_w": c1wp, "c1_b": c1bp, "c2_w": c2wp, "c2_b": c2bp,
            "s1": _sel_matrix(CONV1_HPAIRS, FRAME1_W - 1),
            "s2": _sel_matrix(CONV2_HPAIRS, FRAME2_W - 1),
            "h_w": hwp, "h_b": hbp, "o_w": owp, "o_b": obp}


# ----------------------------------------------------------------------------
# Forward passes (match torch Net(mode=1|2).forward semantics)
# ----------------------------------------------------------------------------
def _prep_conv1_input(x_nchw):
    n = x_nchw.shape[0]
    x = jnp.transpose(x_nchw, (0, 2, 3, 1))                      # NHWC
    x = jnp.pad(x, ((0, 0), (2, 3), (2, 2), (0, CIN1_PAD - 1)))  # (n,33,32,8)
    return x.reshape(n, CONV1_IN_ROWS, CIN1_PAD).astype(jnp.bfloat16)


def net_forward_mode1(x, p):
    # Net(mode=1): view(-1, 784) -> Linear -> sigmoid -> Linear -> LogSoftmax
    n = x.shape[0]
    xf = x.reshape(n, 28 * 28)
    xf = jnp.pad(xf, ((0, 0), (0, MODE1_D - 28 * 28))).astype(jnp.bfloat16)
    return mlp_head(xf, p["h_w"], p["h_b"], p["o_w"], p["o_b"], N_CLASSES)


def net_forward_mode2(x_nchw, p):
    # Net(mode=2): (conv->relu->pool) x2, flatten, Linear->sigmoid->Linear,
    #              LogSoftmax.
    n = x_nchw.shape[0]
    x1 = _prep_conv1_input(x_nchw)
    y1 = conv_relu_pool(x1, p["c1_w"], p["c1_b"], p["s1"],
                        frame_w=FRAME1_W, n_hpairs=CONV1_HPAIRS,
                        tap_offsets=TAPS1, out_row_starts=OUT_STARTS1,
                        out_rows=CONV1_OUT_ROWS)
    y2 = conv_relu_pool(y1, p["c2_w"], p["c2_b"], p["s2"],
                        frame_w=FRAME2_W, n_hpairs=CONV2_HPAIRS,
                        tap_offsets=TAPS2, out_row_starts=OUT_STARTS2,
                        out_rows=CONV2_OUT_ROWS)
    feat = y2.reshape(n, FEAT_DIM)                 # free metadata reshape
    return mlp_head(feat, p["h_w"], p["h_b"], p["o_w"], p["o_b"], N_CLASSES)


# ----------------------------------------------------------------------------
if __name__ == "__main__":
    key = jax.random.PRNGKey(0)
    kx, kp1, kp2 = jax.random.split(key, 3)
    hidden_size = 32

    x = jax.random.normal(kx, (2, 1, 28, 28), jnp.float32)

    params1 = init_params_mode1(kp1, hidden_size)
    params2 = init_params_mode2(kp2, hidden_size)

    logits1 = jax.jit(net_forward_mode1)(x, params1)
    logits2 = jax.jit(net_forward_mode2)(x, params2)
    jax.block_until_ready((logits1, logits2))

    assert logits1.shape == (2, N_CLASSES) and logits2.shape == (2, N_CLASSES)
    assert bool(jnp.all(jnp.isfinite(logits1)))
    assert bool(jnp.all(jnp.isfinite(logits2)))
    # log-softmax rows must normalize to ~1
    assert bool(jnp.allclose(jnp.sum(jnp.exp(logits1), -1), 1.0, atol=1e-4))
    assert bool(jnp.allclose(jnp.sum(jnp.exp(logits2), -1), 1.0, atol=1e-4))
    print("KERNEL_OK")
</pallas_src>

<mosaic_0001>
module attributes {stable_mosaic.version = 11 : i64} {
  func.func @_mlp_logsoftmax_kernel(%arg0: i32, %arg1: memref<8x896xbf16, #tpu.memory_space<vmem>>, %arg2: memref<896x128xbf16, #tpu.memory_space<vmem>>, %arg3: memref<1x128xf32, #tpu.memory_space<vmem>>, %arg4: memref<128x128xbf16, #tpu.memory_space<vmem>>, %arg5: memref<1x128xf32, #tpu.memory_space<vmem>>, %arg6: memref<8x128xf32, #tpu.memory_space<vmem>>) attributes {dimension_semantics = [#tpu.dimension_semantics<parallel>], iteration_bounds = array<i64: 1>, scalar_prefetch = 0 : i64, scratch_operands = 0 : i64, tpu.core_type = #tpu.core_type<tc>, window_params = [{transform_indices = @transform_0, window_bounds = array<i64: 8, 896>}, {pipeline_mode = #tpu.pipeline_mode<synchronous>, transform_indices = @transform_1, window_bounds = array<i64: 896, 128>}, {pipeline_mode = #tpu.pipeline_mode<synchronous>, transform_indices = @transform_2, window_bounds = array<i64: 1, 128>}, {pipeline_mode = #tpu.pipeline_mode<synchronous>, transform_indices = @transform_3, window_bounds = array<i64: 128, 128>}, {pipeline_mode = #tpu.pipeline_mode<synchronous>, transform_indices = @transform_4, window_bounds = array<i64: 1, 128>}, {transform_indices = @transform_5, window_bounds = array<i64: 8, 128>}]} {
    %cst = arith.constant 0.000000e+00 : f32
    %0 = vector.broadcast %cst : f32 to vector<8x128xf32>
    %c0 = arith.constant 0 : index
    %c0_0 = arith.constant 0 : index
    %1 = vector.load %arg1[%c0, %c0_0] : memref<8x896xbf16, #tpu.memory_space<vmem>>, vector<8x512xbf16>
    %c0_1 = arith.constant 0 : index
    %c0_2 = arith.constant 0 : index
    %2 = vector.load %arg2[%c0_1, %c0_2] : memref<896x128xbf16, #tpu.memory_space<vmem>>, vector<512x128xbf16>
    %cst_3 = arith.constant dense<0.000000e+00> : vector<8x128xf32>
    %3 = tpu.matmul %1, %2, %cst_3 {dimension_numbers = #tpu.dot_dimension_numbers<[1], [0], [0], [1], [0, 0, 1, 1], [], []>} : vector<8x512xbf16>, vector<512x128xbf16>, vector<8x128xf32> -> vector<8x128xf32>
    %4 = arith.addf %0, %3 : vector<8x128xf32>
    %c0_4 = arith.constant 0 : index
    %c512 = arith.constant 512 : index
    %5 = vector.load %arg1[%c0_4, %c512] : memref<8x896xbf16, #tpu.memory_space<vmem>>, vector<8x384xbf16>
    %c512_5 = arith.constant 512 : index
    %c0_6 = arith.constant 0 : index
    %6 = vector.load %arg2[%c512_5, %c0_6] : memref<896x128xbf16, #tpu.memory_space<vmem>>, vector<384x128xbf16>
    %cst_7 = arith.constant dense<0.000000e+00> : vector<8x128xf32>
    %7 = tpu.matmul %5, %6, %cst_7 {dimension_numbers = #tpu.dot_dimension_numbers<[1], [0], [0], [1], [0, 0, 1, 1], [], []>} : vector<8x384xbf16>, vector<384x128xbf16>, vector<8x128xf32> -> vector<8x128xf32>
    %8 = arith.addf %4, %7 : vector<8x128xf32>
    %c0_8 = arith.constant 0 : index
    %c0_9 = arith.constant 0 : index
    %9 = vector.load %arg3[%c0_8, %c0_9] : memref<1x128xf32, #tpu.memory_space<vmem>>, vector<1x128xf32>
    %10 = vector.broadcast %9 : vector<1x128xf32> to vector<8x128xf32>
    %11 = arith.addf %8, %10 : vector<8x128xf32>
    %cst_10 = arith.constant 0.000000e+00 : f32
    %12 = vector.broadcast %cst_10 : f32 to vector<8x128xf32>
    %13 = arith.subf %12, %11 : vector<8x128xf32>
    %14 = math.exp %13 : vector<8x128xf32>
    %cst_11 = arith.constant 1.000000e+00 : f32
    %15 = vector.broadcast %cst_11 : f32 to vector<8x128xf32>
    %16 = arith.addf %15, %14 : vector<8x128xf32>
    %cst_12 = arith.constant 1.000000e+00 : f32
    %17 = vector.broadcast %cst_12 : f32 to vector<8x128xf32>
    %18 = arith.divf %17, %16 : vector<8x128xf32>
    %19 = arith.truncf %18 : vector<8x128xf32> to vector<8x128xbf16>
    %c0_13 = arith.constant 0 : index
    %c0_14 = arith.constant 0 : index
    %20 = vector.load %arg4[%c0_13, %c0_14] : memref<128x128xbf16, #tpu.memory_space<vmem>>, vector<128x128xbf16>
    %cst_15 = arith.constant dense<0.000000e+00> : vector<8x128xf32>
    %21 = tpu.matmul %19, %20, %cst_15 {dimension_numbers = #tpu.dot_dimension_numbers<[1], [0], [0], [1], [0, 0, 1, 1], [], []>} : vector<8x128xbf16>, vector<128x128xbf16>, vector<8x128xf32> -> vector<8x128xf32>
    %c0_16 = arith.constant 0 : index
    %c0_17 = arith.constant 0 : index
    %22 = vector.load %arg5[%c0_16, %c0_17] : memref<1x128xf32, #tpu.memory_space<vmem>>, vector<1x128xf32>
    %23 = vector.broadcast %22 : vector<1x128xf32> to vector<8x128xf32>
    %24 = arith.addf %21, %23 : vector<8x128xf32>
    %25 = tpu.iota {dimensions = array<i32: 1>} : vector<8x128xi32>
    %c10_i32 = arith.constant 10 : i32
    %26 = vector.broadcast %c10_i32 : i32 to vector<8x128xi32>
    %27 = arith.cmpi slt, %25, %26 : vector<8x128xi32>
    %cst_18 = arith.constant -1.000000e+30 : f32
    %28 = vector.broadcast %cst_18 : f32 to vector<8x128xf32>
    %29 = arith.select %27, %24, %28 : vector<8x128xi1>, vector<8x128xf32>
    %cst_19 = arith.constant dense<0xFF800000> : vector<8xf32>
    %30 = vector.multi_reduction <maximumf>, %29, %cst_19 [1] : vector<8x128xf32> to vector<8xf32>
    %31 = vector.shape_cast %30 : vector<8xf32> to vector<8x1xf32>
    %32 = vector.broadcast %31 : vector<8x1xf32> to vector<8x128xf32>
    %33 = arith.subf %29, %32 : vector<8x128xf32>
    %34 = math.exp %33 : vector<8x128xf32>
    %cst_20 = arith.constant dense<0.000000e+00> : vector<8xf32>
    %35 = vector.multi_reduction <add>, %34, %cst_20 [1] : vector<8x128xf32> to vector<8xf32>
    %36 = vector.shape_cast %35 : vector<8xf32> to vector<8x1xf32>
    %37 = math.log %36 : vector<8x1xf32>
    %38 = vector.broadcast %31 : vector<8x1xf32> to vector<8x128xf32>
    %39 = arith.subf %29, %38 : vector<8x128xf32>
    %40 = vector.broadcast %37 : vector<8x1xf32> to vector<8x128xf32>
    %41 = arith.subf %39, %40 : vector<8x128xf32>
    %c0_21 = arith.constant 0 : index
    %c0_22 = arith.constant 0 : index
    %42 = vector.load %arg6[%c0_21, %c0_22] : memref<8x128xf32, #tpu.memory_space<vmem>>, vector<8x128xf32>
    tpu.vector_store %arg6[%c0_21, %c0_22], %41 {strides = array<i32>} : memref<8x128xf32, #tpu.memory_space<vmem>>, vector<8x128xf32>,
    return
  }
  func.func @transform_0(%arg0: i32) -> (i32, i32) {
    %c0_i32 = arith.constant 0 : i32
    %c0_i32_0 = arith.constant 0 : i32
    return %arg0, %c0_i32 : i32, i32
  }
  func.func @transform_1(%arg0: i32) -> (i32, i32) {
    %c0_i32 = arith.constant 0 : i32
    %c0_i32_0 = arith.constant 0 : i32
    %c0_i32_1 = arith.constant 0 : i32
    return %c0_i32, %c0_i32_0 : i32, i32
  }
  func.func @transform_2(%arg0: i32) -> (i32, i32) {
    %c0_i32 = arith.constant 0 : i32
    %c0_i32_0 = arith.constant 0 : i32
    %c0_i32_1 = arith.constant 0 : i32
    return %c0_i32, %c0_i32_0 : i32, i32
  }
  func.func @transform_3(%arg0: i32) -> (i32, i32) {
    %c0_i32 = arith.constant 0 : i32
    %c0_i32_0 = arith.constant 0 : i32
    %c0_i32_1 = arith.constant 0 : i32
    return %c0_i32, %c0_i32_0 : i32, i32
  }
  func.func @transform_4(%arg0: i32) -> (i32, i32) {
    %c0_i32 = arith.constant 0 : i32
    %c0_i32_0 = arith.constant 0 : i32
    %c0_i32_1 = arith.constant 0 : i32
    return %c0_i32, %c0_i32_0 : i32, i32
  }
  func.func @transform_5(%arg0: i32) -> (i32, i32) {
    %c0_i32 = arith.constant 0 : i32
    %c0_i32_0 = arith.constant 0 : i32
    return %arg0, %c0_i32 : i32, i32
  }
}

</mosaic_0001>

<bundles_post_ra>
// kernel: net_forward_mode1.1
= control target key start
LH: loop header
LB: loop body
LE: loop exit
PB: predicated region body
PF: predicated region fallthrough
CT: control target
= control target key end

     0   :  { %10 = vsyncpa [#allocation3], 0  ;;  %s1123_s18 = smov [#allocation2]   ;;  %s1235_s0 = inlined_call_operand.vmem [shape: bf16[8,896], index: 0, kind: input, shape index: {}]   ;;  %s1236_s1 = inlined_call_operand.hbm [shape: bf16[896,128], index: 1, kind: input, shape index: {}]   ;;  %s1237_s2 = inlined_call_operand.vmem [shape: f32[1,128], index: 2, kind: input, shape index: {}]   ;;  %s1238_s3 = inlined_call_operand.vmem [shape: bf16[128,128], index: 3, kind: input, shape index: {}]   ;;  %s1239_s4 = inlined_call_operand.vmem [shape: f32[1,128], index: 4, kind: input, shape index: {}]   ;;  %s1240_s5 = inlined_call_operand.vmem [shape: f32[8,128], index: 5, kind: output, shape index: {}]  }
   0x1   :  { %s18_s19 = sshll.u32 %s1123_s18, 4  ;;  %s1099_s22 = scalar_lea.hbm %s1236_s1, 7168  ;;  %s19_s19 = int_to_ptr.vmem [resolvable:$true] %s18_s19 }
   0x2   :  { %p1100_p0 = scmp.ne.s32.totalorder %s1236_s1, %s1099_s22  ;;  %p1103_p1 = scmp.lt.u32.totalorder %s1099_s22, %s1236_s1 }
   0x4   :  { %p1105_p2 = pnand %p1103_p1, %p1100_p0 }
   0x6   :  { %1108 = shalt.err (!%p1105_p2)
}
   0x7   :  { %s1109_s27 = scalar_lea.vmem %s19_s19, 7168  ;;  %p1114_p4 = scmp.lt.s32.totalorder %s19_s19, %s19_s19 }
   0x8   :  { %p1110_p3 = scmp.ne.s32.totalorder %s19_s19, %s1109_s27  ;;  %p1115_p5 = scmp.lt.s32.totalorder %s1109_s27, %s1109_s27 }
   0xa   :  { %p1116_p6 = por %p1115_p5, %p1114_p4 }
   0xc   :  { %p1117_p7 = pnand %p1116_p6, %p1110_p3 }
   0xe   :  { %1120 = shalt.err (!%p1117_p7)
}
   0xf   :  { %s1124_s28 = smov 64   ;;  %s1125_s29 = smov 4  }
  0x10   :  { %24 = dma.hbm_to_vmem [thread:$0]  %s1236_s1, 7168, %s19_s19, [#allocation3], %s1124_s28, %s1124_s28, %s1125_s29  }
  0x11   :  { %1121 = dma.done.wait [#allocation3], 7168  }
  0x12   :  { %1122 = vsyncadd [#allocation3], 4294960128  ;;  %v1126_v0 = vmov 0.0   ;;  %vm1127_vm0 = vmmov 0   ;;  %v1020_v1 = vld [vmem:[#allocation2 + $0x140] sm:$0xff]   ;;  %v1023_v4 = vld [vmem:[#allocation2 + $0x148] sm:$0xff]  }
  0x13   :  { %975 = vmatprep.subr.bf16.mxu1 %v1126_v0  ;;  %991 = vmatprep.mubr.msk.bf16.mxu1 %vm1127_vm0, %v1126_v0  ;;  %v1021_v2 = vld [vmem:[#allocation2 + $0x180] sm:$0xff]   ;;  %v1024_v5 = vld [vmem:[#allocation2 + $0x188] sm:$0xff]   ;;  %v1026_v7 = vld [vmem:[#allocation2 + $0x150] sm:$0xff]  }
  0x14   :  { %891 = vmatprep.subr.bf16.mxu0 %v1020_v1  ;;  %v1022_v3 = vld [vmem:[#allocation2 + $0x100] sm:$0xff]   ;;  %976 = vmatpush3.bf16.msra.mxu1 %v1021_v2  ;;  %v1025_v6 = vld [vmem:[#allocation2 + $0x108] sm:$0xff]   ;;  %v1027_v8 = vld [vmem:[#allocation2 + $0x190] sm:$0xff]  }
  0x15   :  { %892 = vmatpush3.bf16.msra.mxu0 %v1022_v3  ;;  %977 = vmatprep.subr.bf16.mxu1 %v1126_v0  ;;  %v1028_v9 = vld [vmem:[#allocation2 + $0x110] sm:$0xff]   ;;  %v1029_v10 = vld [vmem:[#allocation2 + $0x158] sm:$0xff]   ;;  %v1032_v13 = vld [vmem:[#allocation2 + $0x160] sm:$0xff]  }
  0x16   :  { %893 = vmatprep.subr.bf16.mxu0 %v1023_v4  ;;  %v1030_v11 = vld [vmem:[#allocation2 + $0x198] sm:$0xff]   ;;  %v1033_v14 = vld [vmem:[#allocation2 + $0x1a0] sm:$0xff]   ;;  %v1035_v16 = vld [vmem:[#allocation2 + $0x168] sm:$0xff]  }
  0x17   :  { %v1031_v12 = vld [vmem:[#allocation2 + $0x118] sm:$0xff]   ;;  %v1034_v15 = vld [vmem:[#allocation2 + $0x120] sm:$0xff]   ;;  %v1036_v17 = vld [vmem:[#allocation2 + $0x1a8] sm:$0xff]  }
  0x18   :  { %978 = vmatpush3.bf16.msra.mxu1 %v1024_v5  ;;  %v1037_v18 = vld [vmem:[#allocation2 + $0x128] sm:$0xff]   ;;  %v1038_v19 = vld [vmem:[#allocation2 + $0x170] sm:$0xff]   ;;  %v1041_v23 = vld [vmem:[#allocation2 + $0x178] sm:$0xff]  }
  0x19   :  { %894 = vmatpush3.bf16.msra.mxu0 %v1025_v6  ;;  %979 = vmatprep.subr.bf16.mxu1 %v1126_v0  ;;  %v1039_v20 = vld [vmem:[#allocation2 + $0x1b0] sm:$0xff]   ;;  %v1042_v24 = vld [vmem:[#allocation2 + $0x1b8] sm:$0xff]   ;;  %v1046_v27 = vld [vmem:[#allocation2 + $0xc0] sm:$0xff]  }
  0x1a   :  { %895 = vmatprep.subr.bf16.mxu0 %v1026_v7  ;;  %v1040_v21 = vld [vmem:[#allocation2 + $0x130] sm:$0xff]   ;;  %v1043_v26 = vld [vmem:[#allocation2 + $0x138] sm:$0xff]   ;;  %v1048_v29 = vld [vmem:[#allocation2 + $0x40] sm:$0xff]  }
  0x1b   :  { %v101_v22 = vld [vmem:[%s1235_s0 + $0x10] sm:$0xff]  ;;  %v1047_v28 = vld [vmem:[%s1235_s0 + $0x18] ss:$0 sps:$4 sm:$0xff]   ;;  %v1049_v30 = vld [vmem:[#allocation2 + $0x80] sm:$0xff]  }
  0x1c   :  { %980 = vmatpush3.bf16.msra.mxu1 %v1027_v8  ;;  %v819_v25 = vcombine.high %v101_v22, %v101_v22  ;;  %v1050_v31 = vld [vmem:[#allocation2] sm:$0xff]   ;;  %v818_v32 = vcombine.low %v101_v22, %v101_v22  ;;  %v1051_v33 = vld [vmem:[#allocation2 + $0xc8] sm:$0xff]   ;;  %v1055_v37 = vld [vmem:[#allocation2 + $0xd0] sm:$0xff]  }
  0x1d   :  { %896 = vmatpush3.bf16.msra.mxu0 %v1028_v9  ;;  %981 = vmatprep.subr.bf16.mxu1 %v1126_v0  ;;  %v1052_v34 = vld [vmem:[#allocation2 + $0x48] sm:$0xff]   ;;  %v1056_v38 = vld [vmem:[#allocation2 + $0x50] sm:$0xff]   ;;  %v1059_v41 = vld [vmem:[#allocation2 + $0xd8] sm:$0xff]  }
  0x1e   :  { %897 = vmatprep.subr.bf16.mxu0 %v1029_v10  ;;  %338 = vmatprep.mubr.bf16.mxu0 %v819_v25  ;;  %v1053_v35 = vld [vmem:[#allocation2 + $0x88] sm:$0xff]   ;;  %v1057_v39 = vld [vmem:[#allocation2 + $0x90] sm:$0xff]   ;;  %v1060_v42 = vld [vmem:[#allocation2 + $0x58] sm:$0xff]  }
  0x1f   :  { %v1054_v36 = vld [vmem:[#allocation2 + $0x8] sm:$0xff]   ;;  %v1058_v40 = vld [vmem:[#allocation2 + $0x10] sm:$0xff]   ;;  %v1061_v43 = vld [vmem:[#allocation2 + $0x98] sm:$0xff]  }
  0x20   :  { %982 = vmatpush3.bf16.msra.mxu1 %v1030_v11  ;;  %v1062_v44 = vld [vmem:[#allocation2 + $0x18] sm:$0xff]   ;;  %v1063_v45 = vld [vmem:[#allocation2 + $0xe0] sm:$0xff]   ;;  %v1067_v49 = vld [vmem:[#allocation2 + $0xe8] sm:$0xff]  }
  0x21   :  { %898 = vmatpush3.bf16.msra.mxu0 %v1031_v12  ;;  %983 = vmatprep.subr.bf16.mxu1 %v1126_v0  ;;  %v1064_v46 = vld [vmem:[#allocation2 + $0x60] sm:$0xff]   ;;  %v1068_v50 = vld [vmem:[#allocation2 + $0x68] sm:$0xff]   ;;  %v1071_v53 = vld [vmem:[#allocation2 + $0xf0] sm:$0xff]  }
  0x22   :  { %899 = vmatprep.subr.bf16.mxu0 %v1032_v13  ;;  %v1065_v47 = vld [vmem:[#allocation2 + $0xa0] sm:$0xff]   ;;  %v1069_v51 = vld [vmem:[#allocation2 + $0xa8] sm:$0xff]   ;;  %v1072_v54 = vld [vmem:[#allocation2 + $0x70] sm:$0xff]  }
  0x23   :  { %v1066_v48 = vld [vmem:[#allocation2 + $0x20] sm:$0xff]   ;;  %v1070_v52 = vld [vmem:[#allocation2 + $0x28] sm:$0xff]   ;;  %v1073_v55 = vld [vmem:[#allocation2 + $0xb0] sm:$0xff]  }
  0x24   :  { %984 = vmatpush3.bf16.msra.mxu1 %v1033_v14  ;;  %v1074_v56 = vld [vmem:[#allocation2 + $0x30] sm:$0xff]   ;;  %v1075_v57 = vld [vmem:[#allocation2 + $0xf8] sm:$0xff]   ;;  %v36_v60 = vld [vmem:[%s1235_s0 + $0x8] sm:$0xff] }
  0x25   :  { %900 = vmatpush3.bf16.msra.mxu0 %v1034_v15  ;;  %985 = vmatprep.subr.bf16.mxu1 %v1126_v0  ;;  %v1076_v58 = vld [vmem:[#allocation2 + $0x78] sm:$0xff]   ;;  %v35_v61 = vld [vmem:[%s1235_s0] sm:$0xff]  ;;  %v848_v63 = vcombine.high %v36_v60, %v36_v60  ;;  %v847_v2 = vcombine.low %v36_v60, %v36_v60  ;;  %v1084_v5 = vld [vmem:[%s1238_s3 + $0x8] sm:$0xff]  }
  0x26   :  { %901 = vmatprep.subr.bf16.mxu0 %v1035_v16  ;;  %v1077_v59 = vld [vmem:[#allocation2 + $0xb8] sm:$0xff]   ;;  %v846_v1 = vcombine.high %v35_v61, %v35_v61  ;;  %v845_v3 = vcombine.low %v35_v61, %v35_v61  ;;  %v1083_v4 = vld [vmem:[%s1238_s3] sm:$0xff]   ;;  %v1085_v6 = vld [vmem:[%s1238_s3 + $0x10] sm:$0xff]  }
  0x27   :  { %v1078_v62 = vld [vmem:[#allocation2 + $0x38] sm:$0xff]   ;;  %v1087_v8 = vld [vmem:[%s1238_s3 + $0x20] sm:$0xff]   ;;  %v1088_v9 = vld [vmem:[%s1238_s3 + $0x28] sm:$0xff]  }
  0x28   :  { %986 = vmatpush3.bf16.msra.mxu1 %v1036_v17  ;;  %v1086_v7 = vld [vmem:[%s1238_s3 + $0x18] sm:$0xff]   ;;  %v1089_v10 = vld [vmem:[%s1238_s3 + $0x30] sm:$0xff]  }
  0x29   :  { %902 = vmatpush3.bf16.msra.mxu0 %v1037_v18  ;;  %987 = vmatprep.subr.bf16.mxu1 %v1126_v0  ;;  %v1090_v11 = vld [vmem:[%s1238_s3 + $0x38] sm:$0xff]  }
  0x2a   :  { %903 = vmatprep.subr.bf16.mxu0 %v1038_v19 }
  0x2c   :  { %988 = vmatpush3.bf16.msra.mxu1 %v1039_v20 }
  0x2d   :  { %904 = vmatpush3.bf16.msra.mxu0 %v1040_v21  ;;  %989 = vmatprep.subr.bf16.mxu1 %v1126_v0 }
  0x2e   :  { %905 = vmatprep.subr.bf16.mxu0 %v1041_v23 }
  0x30   :  { %990 = vmatpush3.bf16.msra.mxu1 %v1042_v24 }
  0x31   :  { %906 = vmatpush3.bf16.msra.mxu0 %v1043_v26  ;;  %944 = vmatprep.subr.bf16.mxu1 %v1046_v27 }
  0x32   :  { %922 = vmatprep.subr.bf16.mxu0 %v1048_v29 }
  0x33   :  { %992 = vmatmul.mubr.bf16.vlgmr.msra.gmra.mrb[0].mxu1 %v1047_v28 }
  0x34   :  { %339 = vmatmul.mubr.bf16.vlgmr.msra.gmra.mrb[0].mxu0 %v818_v32  ;;  %945 = vmatpush3.bf16.msra.mxu1 %v1049_v30  ;;  %v881_v32 = vld [vmem:[%s1237_s2] ss:$0 sm:$0xff] }
  0x35   :  { %923 = vmatpush3.bf16.msra.mxu0 %v1050_v31  ;;  %946 = vmatprep.subr.bf16.mxu1 %v1051_v33 }
  0x36   :  { %924 = vmatprep.subr.bf16.mxu0 %v1052_v34  ;;  %664 = vmatprep.mubr.bf16.mxu1 %v848_v63 }
  0x37   :  { %624 = vmatprep.mubr.bf16.mxu0 %v846_v1 }
  0x38   :  { %947 = vmatpush3.bf16.msra.mxu1 %v1053_v35 }
  0x39   :  { %925 = vmatpush3.bf16.msra.mxu0 %v1054_v36  ;;  %948 = vmatprep.subr.bf16.mxu1 %v1055_v37 }
  0x3a   :  { %926 = vmatprep.subr.bf16.mxu0 %v1056_v38 }
  0x3c   :  { %949 = vmatpush3.bf16.msra.mxu1 %v1057_v39 }
  0x3d   :  { %927 = vmatpush3.bf16.msra.mxu0 %v1058_v40  ;;  %950 = vmatprep.subr.bf16.mxu1 %v1059_v41  ;;  %v798_v41 = vlaneseq }
  0x3e   :  { %928 = vmatprep.subr.bf16.mxu0 %v1060_v42 }
  0x3f   :  { %v799_v42 = vand.u32 127, %v798_v41 }
  0x40   :  { %951 = vmatpush3.bf16.msra.mxu1 %v1061_v43  ;;  %v882_v43 = vld [vmem:[%s1239_s4] ss:$0 sm:$0xff] }
  0x41   :  { %929 = vmatpush3.bf16.msra.mxu0 %v1062_v44  ;;  %952 = vmatprep.subr.bf16.mxu1 %v1063_v45  ;;  %vm800_vm1 = vcmp.lt.s32.totalorder %v799_v42, 10 }
  0x42   :  { %930 = vmatprep.subr.bf16.mxu0 %v1064_v46 }
  0x44   :  { %953 = vmatpush3.bf16.msra.mxu1 %v1065_v47 }
  0x45   :  { %931 = vmatpush3.bf16.msra.mxu0 %v1066_v48  ;;  %954 = vmatprep.subr.bf16.mxu1 %v1067_v49 }
  0x46   :  { %932 = vmatprep.subr.bf16.mxu0 %v1068_v50 }
  0x48   :  { %955 = vmatpush3.bf16.msra.mxu1 %v1069_v51 }
  0x49   :  { %933 = vmatpush3.bf16.msra.mxu0 %v1070_v52  ;;  %956 = vmatprep.subr.bf16.mxu1 %v1071_v53 }
  0x4a   :  { %934 = vmatprep.subr.bf16.mxu0 %v1072_v54 }
  0x4c   :  { %957 = vmatpush3.bf16.msra.mxu1 %v1073_v55 }
  0x4d   :  { %935 = vmatpush3.bf16.msra.mxu0 %v1074_v56  ;;  %958 = vmatprep.subr.bf16.mxu1 %v1075_v57 }
  0x4e   :  { %936 = vmatprep.subr.bf16.mxu0 %v1076_v58 }
  0x50   :  { %959 = vmatpush3.bf16.msra.mxu1 %v1077_v59 }
  0x51   :  { %937 = vmatpush3.bf16.msra.mxu0 %v1078_v62 }
  0x52   :  { %995 = vmatprep.subr.bf16.mxu0 %v1126_v0 }
  0x53   :  { %665 = vmatmul.mubr.bf16.vlgmr.msra.gmra.mrb[4].mxu1 %v847_v2 }
  0x54   :  { %625 = vmatmul.mubr.bf16.vlgmr.msra.gmra.mrb[4].mxu0 %v845_v3 }
  0x55   :  { %1011 = vmatprep.mubr.msk.bf16.mxu0 %vm1127_vm0, %v1126_v0  ;;  %996 = vmatpush3.bf16.msra.mxu0 %v1083_v4 }
  0x56   :  { %997 = vmatprep.subr.bf16.mxu0 %v1126_v0 }
  0x59   :  { %998 = vmatpush3.bf16.msra.mxu0 %v1084_v5 }
  0x5a   :  { %999 = vmatprep.subr.bf16.mxu0 %v1126_v0 }
  0x5d   :  { %1000 = vmatpush3.bf16.msra.mxu0 %v1085_v6 }
  0x5e   :  { %1001 = vmatprep.subr.bf16.mxu0 %v1126_v0 }
  0x61   :  { %1002 = vmatpush3.bf16.msra.mxu0 %v1086_v7 }
  0x62   :  { %1003 = vmatprep.subr.bf16.mxu0 %v1126_v0 }
  0x65   :  { %1004 = vmatpush3.bf16.msra.mxu0 %v1087_v8 }
  0x66   :  { %1005 = vmatprep.subr.bf16.mxu0 %v1126_v0 }
  0x69   :  { %1006 = vmatpush3.bf16.msra.mxu0 %v1088_v9 }
  0x6a   :  { %1007 = vmatprep.subr.bf16.mxu0 %v1126_v0 }
  0x6d   :  { %1008 = vmatpush3.bf16.msra.mxu0 %v1089_v10 }
  0x6e   :  { %1009 = vmatprep.subr.bf16.mxu0 %v1126_v0 }
  0x71   :  { %1010 = vmatpush3.bf16.msra.mxu0 %v1090_v11 }
 0x106   :  { %v380_v12 = vpop.f32.mrb[0].mxu1 }
 0x107   :  { %v907_v13 = vpop.f32.mrb[0].mxu0  ;;  %v993_v14 = vpop.f32.mrb[1].mxu1 }
 0x108   :  { %v908_v15 = vpop.f32.mrb[1].mxu0  ;;  %v383_v16 = vpop.f32.mrb[2].mxu1 }
 0x109   :  { %v909_v17 = vadd.f32 %v908_v15, %v907_v13  ;;  %v910_v18 = vpop.f32.mrb[2].mxu0  ;;  %v994_v19 = vpop.f32.mrb[3].mxu1 }
 0x10a   :  { %v911_v20 = vpop.f32.mrb[3].mxu0 }
 0x10b   :  { %v381_v21 = vadd.f32 %v909_v17, %v380_v12 }
 0x126   :  { %v960_v22 = vpop.f32.mrb[4].mxu1 }
 0x127   :  { %v938_v23 = vpop.f32.mrb[4].mxu0  ;;  %v961_v24 = vpop.f32.mrb[5].mxu1 }
 0x128   :  { %v962_v25 = vadd.f32 %v961_v24, %v960_v22  ;;  %v939_v26 = vpop.f32.mrb[5].mxu0  ;;  %v963_v27 = vpop.f32.mrb[6].mxu1 }
 0x129   :  { %v940_v28 = vadd.f32 %v939_v26, %v938_v23  ;;  %v941_v29 = vpop.f32.mrb[6].mxu0  ;;  %v964_v0 = vpop.f32.mrb[7].mxu1 }
 0x12a   :  { %v942_v30 = vpop.f32.mrb[7].mxu0 }
 0x12b   :  { %v627_v31 = vadd.f32 %v940_v28, %v381_v21 }
 0x12d   :  { %v667_v33 = vadd.f32 %v962_v25, %v627_v31 }
 0x12f   :  { %v679_v34 = vadd.f32 %v881_v32, %v667_v33 }
 0x131   :  { %v680_v35 = vsub.f32 0.0, %v679_v34 }
 0x133   :  { %v681_v36 = vmul.f32 1.442695, %v680_v35 }
 0x135   :  { %1091 = vpow2.f32 %v681_v36 }
 0x13f   :  { %v1092_v37 = vpop.eup %1091 }
 0x140   :  { %v683_v38 = vadd.f32 1.0, %v1092_v37 }
 0x142   :  { %1093 = vrcp.f32 %v683_v38 }
 0x14c   :  { %v1094_v39 = vpop.eup %1093 }
 0x14d   :  { %v686_v40 = vpack.c.bf16 %v1094_v39, %v1094_v39 }
 0x14f   :  { %1012 = vmatmul.mubr.bf16.vlgmr.msra.gmra.mrb[8].mxu0 %v686_v40 }
 0x222   :  { %v792_v44 = vpop.f32.mrb[8].mxu0 }
 0x223   :  { %v793_v45 = vadd.f32 %v882_v43, %v792_v44  ;;  %v1013_v46 = vpop.f32.mrb[9].mxu0 }
 0x224   :  { %v795_v47 = vpop.f32.mrb[10].mxu0 }
 0x225   :  { %v1014_v48 = vpop.f32.mrb[11].mxu0  ;;  %v801_v49 = vsel %vm800_vm1, %v793_v45, -1e+30 }
 0x226   :  { %802 = vmax.xlane.f32.xlu0 %v801_v49 }
 0x2b3   :  { %v803_v50 = vpop.xlane.xlu0 %802 }
 0x2b4   :  { %v804_v51 = vsub.f32 %v801_v49, %v803_v50 }
 0x2b6   :  { %v805_v52 = vmul.f32 1.442695, %v804_v51 }
 0x2b8   :  { %1095 = vpow2.f32 %v805_v52 }
 0x2c2   :  { %v1096_v53 = vpop.eup %1095 }
 0x2c3   :  { %807 = vadd.xlane.f32.xlu0 %v1096_v53 }
 0x350   :  { %v808_v54 = vpop.xlane.xlu0 %807 }
 0x351   :  { %1097 = vlog2.f32 %v808_v54 }
 0x35b   :  { %v1098_v55 = vpop.eup %1097 }
 0x35c   :  { %v810_v56 = vmul.f32 0.6931472, %v1098_v55 }
 0x35e   :  { %v811_v57 = vsub.f32 %v804_v51, %v810_v56 }
 0x360   :  { %812 = vst [vmem:[%s1240_s5] sm:$0xff] %v811_v57 }
 0x361   :  { %817 = vsyncpa [#allocation3], 1 }

</bundles_post_ra>
